<compile_context>
chip_gen: v7x
topology: tpu7x:2x2x1
jax: 0.10.0
libtpu: 0.0.40
codegen_flags: <defaults>
</compile_context>

<pallas_src>
import jax
import jax.numpy as jnp
from jax.experimental import pallas as pl
from jax.experimental.pallas import tpu as pltpu


def _dma_clone_kernel(x_ref, o_ref, sem):
    # Whole-ref async copy between two pl.ANY (HBM) refs: a single DMA that
    # saturates HBM bandwidth with no VMEM/vreg round trip.
    cp = pltpu.make_async_copy(x_ref, o_ref, sem)
    cp.start()
    cp.wait()


_CLONE_CACHE = {}


def _get_clone_fn(shape, dtype):
    """Build (once per shape/dtype) a jit'd single-DMA HBM->HBM clone."""
    key = (tuple(shape), jnp.dtype(dtype).name)
    fn = _CLONE_CACHE.get(key)
    if fn is None:
        fn = jax.jit(
            pl.pallas_call(
                _dma_clone_kernel,
                out_shape=jax.ShapeDtypeStruct(tuple(shape), dtype),
                in_specs=[pl.BlockSpec(memory_space=pl.ANY)],
                out_specs=pl.BlockSpec(memory_space=pl.ANY),
                scratch_shapes=[pltpu.SemaphoreType.DMA],
            )
        )
        _CLONE_CACHE[key] = fn
    return fn


def pallas_clone(val: jax.Array) -> jax.Array:
    """`detach().clone()` analogue: a distinct on-device buffer via one DMA."""
    val = jnp.asarray(val)
    if val.size == 0 or val.ndim == 0:
        # Nothing worth a DMA; JAX arrays are immutable so the value itself
        # already behaves like a detached snapshot.
        return jax.lax.stop_gradient(val)
    return _get_clone_fn(val.shape, val.dtype)(jax.lax.stop_gradient(val))


def _as_value(val) -> jax.Array:
    """torch.Tensor(val)-like coercion.

    Consistent for every input kind (Python scalars/lists, NumPy, jax.Array):
    non-floating dtypes are cast to float32 (torch's default float type);
    existing float dtypes (f32, bf16, ...) are preserved.
    """
    arr = jnp.asarray(val)
    if not jnp.issubdtype(arr.dtype, jnp.floating):
        arr = arr.astype(jnp.float32)
    return arr


class Parameter:
    """JAX/Pallas analogue of the PyTorch `Parameter` module.

    Holds a value that can be frozen (returned as a constant snapshot) or
    trainable (returned as the parameter).  The `frozen` flag is what a
    training loop would use to exclude the value from optimizer state.
    """

    def __init__(self, val, frozen: bool = False):
        val = _as_value(val)
        self.val = val     # frozen snapshot  (analogue of self.val)
        self.param = val   # trainable value  (analogue of self.param)
        self.frozen = frozen

    def forward(self) -> jax.Array:
        # Pure identity access: returning the stored array directly matches the
        # PyTorch semantics and is the fastest possible path (no HBM traffic,
        # no kernel launch).
        if self.frozen:
            # TODO(synk): `.to(self.param.device)` placement has no Pallas
            # equivalent; device placement is handled by jit/sharding outside.
            return self.val
        return self.param

    __call__ = forward

    def freeze(self):
        # detach().clone(): take a distinct on-device snapshot through the
        # single-DMA Pallas clone kernel.
        self.val = pallas_clone(self.param)
        self.frozen = True

    def unfreeze(self):
        self.frozen = False

    def __repr__(self):
        return "val: {}, param: {}, frozen: {}".format(
            self.val, self.param, self.frozen
        )

    # TODO(synk): nn.Parameter gradient / requires_grad tracking has no Pallas
    # equivalent; it is handled by the JAX training loop outside this module.


if __name__ == "__main__":
    key = jax.random.PRNGKey(0)
    k1, k2 = jax.random.split(key)

    # 4-D float32 parameter (2, 4, 16, 16).
    x = jax.random.normal(k1, (2, 4, 16, 16), dtype=jnp.float32)
    p = Parameter(x, frozen=False)

    # forward(): identity access, no kernel, exact value.
    out = jax.block_until_ready(p())
    assert out.shape == (2, 4, 16, 16) and out.dtype == jnp.float32
    assert jnp.array_equal(out, x)

    # Exercise the Pallas single-DMA clone kernel directly.
    cloned = jax.block_until_ready(pallas_clone(x))
    assert cloned.shape == x.shape and cloned.dtype == x.dtype
    assert jnp.array_equal(cloned, x)

    # freeze() routes through the same kernel (detach().clone() analogue).
    p.freeze()
    frozen_out = jax.block_until_ready(p())
    assert frozen_out.shape == x.shape and frozen_out.dtype == jnp.float32
    assert jnp.array_equal(frozen_out, x)

    # unfreeze(): back to returning the trainable parameter directly.
    p.unfreeze()
    out_again = jax.block_until_ready(p())
    assert jnp.array_equal(out_again, x)

    # bf16 parameter with a lane-aligned last dim: new cached clone entry,
    # dtype preserved (no f32 upcast).
    y = jax.random.normal(k2, (8, 128), dtype=jnp.bfloat16)
    q = Parameter(y)
    q.freeze()
    out_q = jax.block_until_ready(q())
    assert out_q.dtype == jnp.bfloat16 and jnp.array_equal(out_q, y)

    # Second freeze of the same shape/dtype reuses the cached jit'd kernel.
    q.unfreeze()
    q.freeze()
    assert jnp.array_equal(jax.block_until_ready(q()), y)

    # Non-float inputs coerce to float32 (torch.Tensor semantics) consistently
    # for Python lists and integer jax arrays.
    r = Parameter([1, 2, 3])
    assert r().dtype == jnp.float32
    r2 = Parameter(jnp.arange(6, dtype=jnp.int32))
    assert r2().dtype == jnp.float32

    print("KERNEL_OK")
</pallas_src>

<mosaic_0001>
module attributes {stable_mosaic.version = 11 : i64} {
  func.func @_dma_clone_kernel(%arg0: memref<2x4x16x16xf32, #tpu.memory_space<any>>, %arg1: memref<2x4x16x16xf32, #tpu.memory_space<any>>, %arg2: memref<!tpu.dma_semaphore, #tpu.memory_space<semaphore_mem>>) attributes {dimension_semantics = [], scalar_prefetch = 0 : i64, scratch_operands = 1 : i64, tpu.core_type = #tpu.core_type<tc>} {
    tpu.enqueue_dma source(%arg0 : memref<2x4x16x16xf32, #tpu.memory_space<any>>) target(%arg1 : memref<2x4x16x16xf32, #tpu.memory_space<any>>) target_semaphore(%arg2 : memref<!tpu.dma_semaphore, #tpu.memory_space<semaphore_mem>>)
    tpu.wait_dma2 semaphore(%arg2 : memref<!tpu.dma_semaphore, #tpu.memory_space<semaphore_mem>>) src(%arg0 : memref<2x4x16x16xf32, #tpu.memory_space<any>>) dst(%arg1 : memref<2x4x16x16xf32, #tpu.memory_space<any>>)
    return
  }
}

</mosaic_0001>

<bundles_post_ra>
// kernel: tpu_custom_call.1
= control target key start
LH: loop header
LB: loop body
LE: loop exit
PB: predicated region body
PF: predicated region fallthrough
CT: control target
= control target key end

     0   :  { %s36_s6 = smov [#allocation2]   ;;  %s37_s7 = smov [#allocation3]   ;;  %s55_s0 = inlined_call_operand.hbm [shape: f32[2,4,16,16], index: 0, kind: input, shape index: {}]   ;;  %s56_s1 = inlined_call_operand.hbm [shape: f32[2,4,16,16], index: 1, kind: output, shape index: {}]  }
   0x1   :  { %s38_s8 = smov 0  }
   0x2   :  { %18 = dma.general %s55_s0, 2048, %s56_s1, %s36_s6, %s37_s7, [#allocation4], %s38_s8, 0  }
   0x3   :  { %34 = dma.done.wait [#allocation2], 2048 }
   0x4   :  { %35 = vsyncadd [#allocation2], 4294965248 }
   0x5   :  { %24 = vsyncmov [#allocation2] }
   0x8   :  { %s25_s13 = vpop.sfrf %24 }
   0x9   :  { %p30_p0 = scmp.ne.s32.totalorder %s25_s13, 0 }
   0xb   :  { %29 = shalt.err (%p30_p0)  }

</bundles_post_ra>
